<compile_context>
chip_gen: v5e
topology: v5e:2x2
jax: 0.10.0
libtpu: 0.0.40
codegen_flags: <defaults>
</compile_context>

<pallas_src>
import functools

import jax
import jax.numpy as jnp
from jax import lax
from jax.experimental import pallas as pl
from jax.experimental.pallas import tpu as pltpu


# ------------------------------ Pallas kernel ------------------------------ #

def _conv3x3_kernel(xc_ref, xn_ref, w_ref, o_ref, *, wp):
    """One row-tile of a 3x3 / stride-1 / pad-1 conv, channels-on-sublane layout.

    xc_ref: (1, Cin, M)      current row-tile of the padded input, M = TH * wp
                             merged (row, col) spatial positions on the lane axis.
    xn_ref: (1, Cin, HALO)   first HALO merged positions of the *next* row-tile.
    w_ref : (9, Cout, Cin)   filter taps in (kh, kw) order.
    o_ref : (1, Cout, M)     output tile, same merged spatial layout (columns >= W
                             of every image row are junk; the wrapper slices them off).
    """
    m = xc_ref.shape[2]
    cout = o_ref.shape[1]

    # Window = current tile + halo of the next tile (covers the 2 extra padded
    # rows + 2 cols needed by the bottom output rows of this tile).
    win = jnp.concatenate([xc_ref[0], xn_ref[0]], axis=1)        # (Cin, M + HALO)

    acc = jnp.zeros((cout, m), jnp.float32)
    for kh in range(3):
        for kw in range(3):
            off = kh * wp + kw                                   # static lane shift
            a = win[:, off:off + m]                              # (Cin, M) bf16
            acc = acc + jnp.dot(w_ref[kh * 3 + kw], a,
                                preferred_element_type=jnp.float32)

    # Lane-dense store: last dim M is a multiple of 128 -> unmasked vst.
    o_ref[0] = acc.astype(o_ref.dtype)


# ------------------------------ host wrapper ------------------------------- #

def _pick_geometry(h, w, row_tile=None, target_m=16384):
    """Choose (row_tile TH, padded width wp, halo) s.t. TH | H, TH*wp % 128 == 0,
    halo is a multiple of 128 dividing TH*wp with halo >= 2*wp + 2."""
    ths = [row_tile] if row_tile is not None else [d for d in range(3, h + 1) if h % d == 0]
    candidates = []
    for th in ths:
        if th < 3 or h % th:
            continue
        for wp in range(w + 2, w + 2 + 128):                     # always finds one
            m = th * wp
            if m % 128:
                continue
            halo = next((c for c in range(128, m + 1, 128)
                         if m % c == 0 and c >= 2 * wp + 2), None)
            if halo is None:
                continue
            candidates.append((th, wp, m, halo))
            break                                                # smallest wp for this TH
    if not candidates:
        # TODO(synk): H < 3 would need a second halo BlockSpec; not supported here.
        raise ValueError(f"H={h} too small for the row-tiled conv kernel")
    fitting = [c for c in candidates if c[2] <= target_m]
    if fitting:
        th, wp, _, halo = max(fitting, key=lambda c: (c[2], -c[1]))
    else:
        th, wp, _, halo = min(candidates, key=lambda c: (c[2], c[1]))
    return th, wp, halo


def conv3x3_same_nchw(x, w_oihw, *, compute_dtype=jnp.bfloat16, row_tile=None):
    """Bias-free 3x3, stride 1, pad 1 conv.  x: (N,Cin,H,W), w: (Cout,Cin,3,3)."""
    n, cin, h, w = x.shape
    cout = w_oihw.shape[0]
    assert w_oihw.shape == (cout, cin, 3, 3), (w_oihw.shape, cin)

    th, wp, halo = _pick_geometry(h, w, row_tile=row_tile)
    assert h % th == 0 and th >= 3, (h, th)
    num_tiles = h // th
    m = th * wp                               # merged spatial positions per tile
    r = h + th                                # padded rows: 1 top + H + (th-1) bottom

    # Exactly one padded copy in HBM; the bf16 cast fuses into the pad.
    xp = jnp.pad(x, ((0, 0), (0, 0), (1, th - 1), (1, wp - w - 1)))
    x_flat = xp.reshape(n, cin, r * wp).astype(compute_dtype)
    # OIHW -> (9 taps, Cout, Cin), tap index = kh*3 + kw.
    w_taps = jnp.transpose(w_oihw.reshape(cout, cin, 9), (2, 0, 1)).astype(compute_dtype)

    kern = functools.partial(_conv3x3_kernel, wp=wp)
    out_flat = pl.pallas_call(
        kern,
        out_shape=jax.ShapeDtypeStruct((n, cout, h * wp), jnp.float32),
        grid=(n, num_tiles),
        in_specs=[
            # current row-tile (lane-dense: last dim m is a multiple of 128)
            pl.BlockSpec((1, cin, m), lambda b, i: (b, 0, i)),
            # halo: first `halo` merged positions of the next row-tile
            pl.BlockSpec((1, cin, halo),
                         lambda b, i: (b, 0, (i + 1) * (m // halo))),
            # full (tiny) weight, resident every step
            pl.BlockSpec((9, cout, cin), lambda b, i: (0, 0, 0)),
        ],
        out_specs=pl.BlockSpec((1, cout, m), lambda b, i: (b, 0, i)),
        compiler_params=pltpu.CompilerParams(
            dimension_semantics=("parallel", "parallel"),
            # Per-step footprint is < 8 MiB even at target_m; 32 MiB scoped
            # limit is safe on v5e/v6e/v7x.
            vmem_limit_bytes=32 * 1024 * 1024,
        ),
    )(x_flat, x_flat, w_taps)

    # Drop the junk right-padding columns of the merged layout (already NCHW).
    out = out_flat.reshape(n, cout, h, wp)[:, :, :, :w]
    return out


def input_stage_forward(params, x_nchw, *, compute_dtype=jnp.bfloat16, row_tile=None):
    """InputStage.forward: x (N, num_in_frames*4, H, W) NCHW -> (N, out_ch, H, W)."""
    return conv3x3_same_nchw(x_nchw, params["conv"],
                             compute_dtype=compute_dtype, row_tile=row_tile)


# --------------------------------- params ---------------------------------- #

def init_params(key, num_in_frames=3, out_ch=16):
    cin = num_in_frames * (3 + 1)
    fan_in = 9 * cin
    w = jax.random.normal(key, (out_ch, cin, 3, 3), jnp.float32) * (2.0 / fan_in) ** 0.5
    return {"conv": w}                                           # OIHW, bias=False


# ----------------------------------- main ----------------------------------- #

if __name__ == "__main__":
    key = jax.random.PRNGKey(0)
    kp, kx = jax.random.split(key)

    NUM_IN_FRAMES, OUT_CH = 3, 16                                # Cin = 12
    N, H, W = 2, 16, 16
    params = init_params(kp, NUM_IN_FRAMES, OUT_CH)
    x = jax.random.uniform(kx, (N, NUM_IN_FRAMES * 4, H, W), jnp.float32)

    # row_tile=8 -> 2 row-tiles per image: exercises the cross-tile halo path.
    fwd = jax.jit(functools.partial(input_stage_forward, row_tile=8))
    out = jax.block_until_ready(fwd(params, x))

    assert out.shape == (N, OUT_CH, H, W)
    assert bool(jnp.all(jnp.isfinite(out)))

    # Validate against XLA's f32 convolution; the tolerance covers the bf16
    # rounding of the kernel's MXU operands (accumulation is f32).
    ref = lax.conv_general_dilated(
        x, params["conv"], window_strides=(1, 1), padding=((1, 1), (1, 1)),
        dimension_numbers=("NCHW", "OIHW", "NCHW"),
        precision=lax.Precision.HIGHEST)
    assert bool(jnp.allclose(out, ref, rtol=5e-2, atol=8e-2))

    print("KERNEL_OK")
</pallas_src>

<mosaic_0001>
module attributes {stable_mosaic.version = 11 : i64} {
  func.func @_conv3x3_kernel(%arg0: i32, %arg1: i32, %arg2: memref<1x12x256xbf16, #tpu.memory_space<vmem>>, %arg3: memref<1x12x128xbf16, #tpu.memory_space<vmem>>, %arg4: memref<9x16x12xbf16, #tpu.memory_space<vmem>>, %arg5: memref<1x16x256xf32, #tpu.memory_space<vmem>>) attributes {dimension_semantics = [#tpu.dimension_semantics<parallel>, #tpu.dimension_semantics<parallel>], iteration_bounds = array<i64: 2, 2>, scalar_prefetch = 0 : i64, scratch_operands = 0 : i64, tpu.core_type = #tpu.core_type<tc>, window_params = [{transform_indices = @transform_0, window_bounds = array<i64: 1, 12, 256>}, {transform_indices = @transform_1, window_bounds = array<i64: 1, 12, 128>}, {pipeline_mode = #tpu.pipeline_mode<synchronous>, transform_indices = @transform_2, window_bounds = array<i64: 9, 16, 12>}, {transform_indices = @transform_3, window_bounds = array<i64: 1, 16, 256>}]} {
    %c0 = arith.constant 0 : index
    %c0_0 = arith.constant 0 : index
    %c0_1 = arith.constant 0 : index
    %0 = vector.load %arg2[%c0, %c0_0, %c0_1] : memref<1x12x256xbf16, #tpu.memory_space<vmem>>, vector<1x12x256xbf16>
    %1 = vector.shape_cast %0 : vector<1x12x256xbf16> to vector<12x256xbf16>
    %c0_2 = arith.constant 0 : index
    %c0_3 = arith.constant 0 : index
    %c0_4 = arith.constant 0 : index
    %2 = vector.load %arg3[%c0_2, %c0_3, %c0_4] : memref<1x12x128xbf16, #tpu.memory_space<vmem>>, vector<1x12x128xbf16>
    %3 = vector.shape_cast %2 : vector<1x12x128xbf16> to vector<12x128xbf16>
    %4 = tpu.concatenate %1, %3 in 1 : vector<12x256xbf16>, vector<12x128xbf16> -> vector<12x384xbf16>
    %cst = arith.constant 0.000000e+00 : f32
    %5 = vector.broadcast %cst : f32 to vector<16x256xf32>
    %6 = vector.extract_strided_slice %4 {offsets = [0, 0], sizes = [12, 256], strides = [1, 1]} : vector<12x384xbf16> to vector<12x256xbf16>
    %c0_5 = arith.constant 0 : index
    %c0_6 = arith.constant 0 : index
    %c0_7 = arith.constant 0 : index
    %7 = vector.load %arg4[%c0_5, %c0_6, %c0_7] : memref<9x16x12xbf16, #tpu.memory_space<vmem>>, vector<1x16x12xbf16>
    %8 = vector.shape_cast %7 : vector<1x16x12xbf16> to vector<16x12xbf16>
    %cst_8 = arith.constant dense<0.000000e+00> : vector<16x256xf32>
    %9 = tpu.matmul %8, %6, %cst_8 {dimension_numbers = #tpu.dot_dimension_numbers<[1], [0], [0], [1], [0, 0, 1, 1], [], []>} : vector<16x12xbf16>, vector<12x256xbf16>, vector<16x256xf32> -> vector<16x256xf32>
    %10 = arith.addf %5, %9 : vector<16x256xf32>
    %11 = vector.extract_strided_slice %4 {offsets = [0, 1], sizes = [12, 256], strides = [1, 1]} : vector<12x384xbf16> to vector<12x256xbf16>
    %c1 = arith.constant 1 : index
    %c0_9 = arith.constant 0 : index
    %c0_10 = arith.constant 0 : index
    %12 = vector.load %arg4[%c1, %c0_9, %c0_10] : memref<9x16x12xbf16, #tpu.memory_space<vmem>>, vector<1x16x12xbf16>
    %13 = vector.shape_cast %12 : vector<1x16x12xbf16> to vector<16x12xbf16>
    %cst_11 = arith.constant dense<0.000000e+00> : vector<16x256xf32>
    %14 = tpu.matmul %13, %11, %cst_11 {dimension_numbers = #tpu.dot_dimension_numbers<[1], [0], [0], [1], [0, 0, 1, 1], [], []>} : vector<16x12xbf16>, vector<12x256xbf16>, vector<16x256xf32> -> vector<16x256xf32>
    %15 = arith.addf %10, %14 : vector<16x256xf32>
    %16 = vector.extract_strided_slice %4 {offsets = [0, 2], sizes = [12, 256], strides = [1, 1]} : vector<12x384xbf16> to vector<12x256xbf16>
    %c2 = arith.constant 2 : index
    %c0_12 = arith.constant 0 : index
    %c0_13 = arith.constant 0 : index
    %17 = vector.load %arg4[%c2, %c0_12, %c0_13] : memref<9x16x12xbf16, #tpu.memory_space<vmem>>, vector<1x16x12xbf16>
    %18 = vector.shape_cast %17 : vector<1x16x12xbf16> to vector<16x12xbf16>
    %cst_14 = arith.constant dense<0.000000e+00> : vector<16x256xf32>
    %19 = tpu.matmul %18, %16, %cst_14 {dimension_numbers = #tpu.dot_dimension_numbers<[1], [0], [0], [1], [0, 0, 1, 1], [], []>} : vector<16x12xbf16>, vector<12x256xbf16>, vector<16x256xf32> -> vector<16x256xf32>
    %20 = arith.addf %15, %19 : vector<16x256xf32>
    %21 = vector.extract_strided_slice %4 {offsets = [0, 32], sizes = [12, 256], strides = [1, 1]} : vector<12x384xbf16> to vector<12x256xbf16>
    %c3 = arith.constant 3 : index
    %c0_15 = arith.constant 0 : index
    %c0_16 = arith.constant 0 : index
    %22 = vector.load %arg4[%c3, %c0_15, %c0_16] : memref<9x16x12xbf16, #tpu.memory_space<vmem>>, vector<1x16x12xbf16>
    %23 = vector.shape_cast %22 : vector<1x16x12xbf16> to vector<16x12xbf16>
    %cst_17 = arith.constant dense<0.000000e+00> : vector<16x256xf32>
    %24 = tpu.matmul %23, %21, %cst_17 {dimension_numbers = #tpu.dot_dimension_numbers<[1], [0], [0], [1], [0, 0, 1, 1], [], []>} : vector<16x12xbf16>, vector<12x256xbf16>, vector<16x256xf32> -> vector<16x256xf32>
    %25 = arith.addf %20, %24 : vector<16x256xf32>
    %26 = vector.extract_strided_slice %4 {offsets = [0, 33], sizes = [12, 256], strides = [1, 1]} : vector<12x384xbf16> to vector<12x256xbf16>
    %c4 = arith.constant 4 : index
    %c0_18 = arith.constant 0 : index
    %c0_19 = arith.constant 0 : index
    %27 = vector.load %arg4[%c4, %c0_18, %c0_19] : memref<9x16x12xbf16, #tpu.memory_space<vmem>>, vector<1x16x12xbf16>
    %28 = vector.shape_cast %27 : vector<1x16x12xbf16> to vector<16x12xbf16>
    %cst_20 = arith.constant dense<0.000000e+00> : vector<16x256xf32>
    %29 = tpu.matmul %28, %26, %cst_20 {dimension_numbers = #tpu.dot_dimension_numbers<[1], [0], [0], [1], [0, 0, 1, 1], [], []>} : vector<16x12xbf16>, vector<12x256xbf16>, vector<16x256xf32> -> vector<16x256xf32>
    %30 = arith.addf %25, %29 : vector<16x256xf32>
    %31 = vector.extract_strided_slice %4 {offsets = [0, 34], sizes = [12, 256], strides = [1, 1]} : vector<12x384xbf16> to vector<12x256xbf16>
    %c5 = arith.constant 5 : index
    %c0_21 = arith.constant 0 : index
    %c0_22 = arith.constant 0 : index
    %32 = vector.load %arg4[%c5, %c0_21, %c0_22] : memref<9x16x12xbf16, #tpu.memory_space<vmem>>, vector<1x16x12xbf16>
    %33 = vector.shape_cast %32 : vector<1x16x12xbf16> to vector<16x12xbf16>
    %cst_23 = arith.constant dense<0.000000e+00> : vector<16x256xf32>
    %34 = tpu.matmul %33, %31, %cst_23 {dimension_numbers = #tpu.dot_dimension_numbers<[1], [0], [0], [1], [0, 0, 1, 1], [], []>} : vector<16x12xbf16>, vector<12x256xbf16>, vector<16x256xf32> -> vector<16x256xf32>
    %35 = arith.addf %30, %34 : vector<16x256xf32>
    %36 = vector.extract_strided_slice %4 {offsets = [0, 64], sizes = [12, 256], strides = [1, 1]} : vector<12x384xbf16> to vector<12x256xbf16>
    %c6 = arith.constant 6 : index
    %c0_24 = arith.constant 0 : index
    %c0_25 = arith.constant 0 : index
    %37 = vector.load %arg4[%c6, %c0_24, %c0_25] : memref<9x16x12xbf16, #tpu.memory_space<vmem>>, vector<1x16x12xbf16>
    %38 = vector.shape_cast %37 : vector<1x16x12xbf16> to vector<16x12xbf16>
    %cst_26 = arith.constant dense<0.000000e+00> : vector<16x256xf32>
    %39 = tpu.matmul %38, %36, %cst_26 {dimension_numbers = #tpu.dot_dimension_numbers<[1], [0], [0], [1], [0, 0, 1, 1], [], []>} : vector<16x12xbf16>, vector<12x256xbf16>, vector<16x256xf32> -> vector<16x256xf32>
    %40 = arith.addf %35, %39 : vector<16x256xf32>
    %41 = vector.extract_strided_slice %4 {offsets = [0, 65], sizes = [12, 256], strides = [1, 1]} : vector<12x384xbf16> to vector<12x256xbf16>
    %c7 = arith.constant 7 : index
    %c0_27 = arith.constant 0 : index
    %c0_28 = arith.constant 0 : index
    %42 = vector.load %arg4[%c7, %c0_27, %c0_28] : memref<9x16x12xbf16, #tpu.memory_space<vmem>>, vector<1x16x12xbf16>
    %43 = vector.shape_cast %42 : vector<1x16x12xbf16> to vector<16x12xbf16>
    %cst_29 = arith.constant dense<0.000000e+00> : vector<16x256xf32>
    %44 = tpu.matmul %43, %41, %cst_29 {dimension_numbers = #tpu.dot_dimension_numbers<[1], [0], [0], [1], [0, 0, 1, 1], [], []>} : vector<16x12xbf16>, vector<12x256xbf16>, vector<16x256xf32> -> vector<16x256xf32>
    %45 = arith.addf %40, %44 : vector<16x256xf32>
    %46 = vector.extract_strided_slice %4 {offsets = [0, 66], sizes = [12, 256], strides = [1, 1]} : vector<12x384xbf16> to vector<12x256xbf16>
    %c8 = arith.constant 8 : index
    %c0_30 = arith.constant 0 : index
    %c0_31 = arith.constant 0 : index
    %47 = vector.load %arg4[%c8, %c0_30, %c0_31] : memref<9x16x12xbf16, #tpu.memory_space<vmem>>, vector<1x16x12xbf16>
    %48 = vector.shape_cast %47 : vector<1x16x12xbf16> to vector<16x12xbf16>
    %cst_32 = arith.constant dense<0.000000e+00> : vector<16x256xf32>
    %49 = tpu.matmul %48, %46, %cst_32 {dimension_numbers = #tpu.dot_dimension_numbers<[1], [0], [0], [1], [0, 0, 1, 1], [], []>} : vector<16x12xbf16>, vector<12x256xbf16>, vector<16x256xf32> -> vector<16x256xf32>
    %50 = arith.addf %45, %49 : vector<16x256xf32>
    %c0_33 = arith.constant 0 : index
    %c0_34 = arith.constant 0 : index
    %c0_35 = arith.constant 0 : index
    %51 = vector.load %arg5[%c0_33, %c0_34, %c0_35] : memref<1x16x256xf32, #tpu.memory_space<vmem>>, vector<1x16x256xf32>
    %52 = vector.shape_cast %51 : vector<1x16x256xf32> to vector<16x256xf32>
    %53 = vector.shape_cast %50 : vector<16x256xf32> to vector<1x16x256xf32>
    tpu.vector_store %arg5[%c0_33, %c0_34, %c0_35], %53 {strides = array<i32>} : memref<1x16x256xf32, #tpu.memory_space<vmem>>, vector<1x16x256xf32>,
    return
  }
  func.func @transform_0(%arg0: i32, %arg1: i32) -> (i32, i32, i32) {
    %c0_i32 = arith.constant 0 : i32
    %c0_i32_0 = arith.constant 0 : i32
    return %arg0, %c0_i32, %arg1 : i32, i32, i32
  }
  func.func @transform_1(%arg0: i32, %arg1: i32) -> (i32, i32, i32) {
    %c1_i32 = arith.constant 1 : i32
    %0 = arith.addi %arg1, %c1_i32 : i32
    %c2_i32 = arith.constant 2 : i32
    %1 = arith.muli %0, %c2_i32 : i32
    %c0_i32 = arith.constant 0 : i32
    %c0_i32_0 = arith.constant 0 : i32
    return %arg0, %c0_i32, %1 : i32, i32, i32
  }
  func.func @transform_2(%arg0: i32, %arg1: i32) -> (i32, i32, i32) {
    %c0_i32 = arith.constant 0 : i32
    %c0_i32_0 = arith.constant 0 : i32
    %c0_i32_1 = arith.constant 0 : i32
    %c0_i32_2 = arith.constant 0 : i32
    return %c0_i32, %c0_i32_0, %c0_i32_1 : i32, i32, i32
  }
  func.func @transform_3(%arg0: i32, %arg1: i32) -> (i32, i32, i32) {
    %c0_i32 = arith.constant 0 : i32
    %c0_i32_0 = arith.constant 0 : i32
    return %arg0, %c0_i32, %arg1 : i32, i32, i32
  }
}

</mosaic_0001>

<bundles_post_ra>
// kernel: input_stage_forward.1
= control target key start
LH: loop header
LB: loop body
LE: loop exit
PB: predicated region body
PF: predicated region fallthrough
CT: control target
= control target key end

     0   :  { %s1266_s12 = smov 0   ;;  %s1268_s13 = smov 0   ;;  %s1485_s0 = inlined_call_operand.vmem [shape: bf16[2,12,768], index: 0, kind: input, shape index: {}, may-alias: {0,1}]   ;;  %s1486_s1 = inlined_call_operand.vmem [shape: bf16[2,12,768], index: 1, kind: input, shape index: {}, may-alias: {0,1}]   ;;  %s1487_s2 = inlined_call_operand.vmem [shape: bf16[9,16,12], index: 2, kind: input, shape index: {}]   ;;  %s1488_s3 = inlined_call_operand.vmem [shape: f32[2,16,512], index: 3, kind: output, shape index: {}]  }
   0x1   :  { %s1270_s14 = smov 0   ;;  %s1272_s15 = smov 0  }
   0x2   :  { %s1274_s16 = smov 0   ;;  %s1276_s17 = smov 0  }
   0x3   :  { %s1278_s18 = smov 0   ;;  %s1280_s19 = smov 0  }
   0x4   :  { %s1282_s20 = smov 0  }
   0x5 LB: > { %s963_s21 = sadd.s32 4294967295, %s1236_s20   ;;  %s22_s22 = sadd.s32 1, %s1228_s18  ;;  %s1236_s20 = sphi %s1282_s20, %s13_s20   ;;  %s1232_s19 = sphi %s1280_s19, %s1502_s19   ;;  %s1228_s18 = sphi %s1278_s18, %s1501_s18   ;;  %s1224_s17 = sphi %s1276_s17, %s1500_s17   ;;  %s1220_s16 = sphi %s1274_s16, %s1499_s16   ;;  %s1216_s15 = sphi %s1272_s15, %s1498_s15   ;;  %s1212_s14 = sphi %s1270_s14, %s1497_s14   ;;  %s1208_s13 = sphi %s1268_s13, %s1496_s13   ;;  %s1204_s12 = sphi %s1266_s12, %s1495_s12  }
   0x6   : > { %p23_p0 = scmp.ge.s32.totalorder %s22_s22, 2  ;;  %s25_s23 = sadd.s32 1, %s1232_s19 }
   0x7   : > { %s34_s24 = sadd.s32 1, %s1216_s15  ;;  %p41_p1 = scmp.ne.s32.totalorder %s1216_s15, %s1212_s14 }
   0x8   : > { %s1504_s22 = smov (%p23_p0, %s22_s22), 0  ;;  %s1506_s23 = smov (!%p23_p0, %s25_s23), %s1232_s19 }
   0x9   : > { %s30_s25 = ssub.s32 %s1228_s18, %s1504_s22  ;;  %p42_p2 = scmp.eq.s32.totalorder %s1236_s20, 0 }
   0xa   : > { %p27_p3 = scmp.ge.s32.totalorder %s1506_s23, 2  ;;  %s1324_s26 = sshll.u32 %s1228_s18, 1 }
   0xb   : > { %p1331_p4 = por %p42_p2, %p41_p1  ;;  %s1070_s28 = sadd.s32 2, %s1324_s26 }
   0xc   : > { %s1508_s23 = smov (%p27_p3, %s1506_s23), 0  ;;  %s1071_s29 = sshll.u32 %s1504_s22, 1 }
   0xd   : > { %1491 = sst [smem:[#allocation5_spill]] %s1508_s23  ;;  %s66_s30 = sadd.s32 1, %s1208_s13 }
   0xe   : > { %s29_s4 = ssub.s32 %s1232_s19, %s1508_s23  ;;  %s1072_s5 = sadd.s32 2, %s1071_s29 }
   0xf   : > { %s31_s6 = sor.u32 %s30_s25, %s29_s4  ;;  %s62_s7 = ssub.s32 %s1070_s28, %s1072_s5 }
  0x10   : > { %p32_p5 = scmp.eq.s32.totalorder %s31_s6, 0  ;;  %s63_s8 = sor.u32 %s62_s7, %s29_s4 }
  0x11   : > { %p64_p6 = scmp.eq.s32.totalorder %s63_s8, 0  ;;  %p73_p7 = scmp.ne.s32.totalorder %s1208_s13, %s1204_s12 }
  0x12   : > { %s1345_s9 = scalar_select %p32_p5, %s1216_s15, %s34_s24  }
  0x13   : > { %s1348_s10 = scalar_select %p64_p6, %s1208_s13, %s66_s30  }
  0x14   : > { %p1352_p8 = por %p73_p7, %p42_p2  ;;  %p126_p9 = scmp.eq.s32.totalorder %s963_s21, 3 }
  0x15   : > { %p968_p11 = scmp.ge.s32.totalorder %s1236_s20, 4 }
  0x16   : > { %p1359_p10 = por %p126_p9, %p41_p1 }
  0x17   : > { %151 = sbr.rel (%p968_p11) target bundleno = 46 (0x2e), region = 20 }
  0x1c   : > { %154 = sbr.rel (!%p1331_p4) target bundleno = 37 (0x25), region = 24  ;;  %s156_s24 = sand.u32 (%p1331_p4), 1, %s1216_s15  }
  0x1d   : > { %s1085_s25 = smul.u32 (%p1331_p4), 12, %s1232_s19  ;;  %s969_s28 = sshll.u32 (%p1331_p4), %s156_s24, 4 }
  0x1e   : > { %s158_s6 = scalar_lea.vmem (%p1331_p4), [#allocation2], %s969_s28 }
  0x1f   : > { %s161_s29 = sadd.s32 (%p1331_p4), %s1085_s25, %s1324_s26 }
  0x20   : > { %s971_s30 = sshll.u32 (%p1331_p4), %s161_s29, 2 }
  0x21   : > { %s163_s5 = scalar_lea.vmem %s1485_s0, %s971_s30 }
  0x22   : > { %v194_v0 = vld [vmem:[%s163_s5] sm:$0xff]  ;;  %v196_v1 = vld [vmem:[%s163_s5 + $0x18] sm:$0xff] }
  0x23   : > { %195 = vst [vmem:[%s158_s6] sm:$0xff] %v194_v0 }
  0x24   : > { %197 = vst [vmem:[%s158_s6 + $0x8] sm:$0xff] %v196_v1 }
  0x25 PF: > { %203 = sbr.rel (!%p1352_p8) target bundleno = 46 (0x2e), region = 62  ;;  %s205_s27 = sand.u32 (%p1352_p8), 1, %s1208_s13  }
  0x26   : > { %s889_s7 = smul.u32 (%p1352_p8), 12, %s1232_s19  ;;  %s972_s8 = sshll.u32 (%p1352_p8), %s205_s27, 3 }
  0x27   : > { %s207_s28 = scalar_lea.vmem (%p1352_p8), [#allocation3], %s972_s8 }
  0x28   : > { %s890_s24 = sadd.s32 (%p1352_p8), %s1324_s26, %s889_s7 }
  0x29   : > { %s974_s25 = sshll.u32 (%p1352_p8), %s890_s24, 2 }
  0x2a   : > { %s892_s30 = scalar_lea.vmem %s1486_s1, %s974_s25 }
  0x2b   : > { %v975_v2 = vld [vmem:[%s892_s30 + $0x8] sm:$0xf]  ;;  %v976_v3 = vld [vmem:[%s892_s30 + $0x20] sm:$0xf] }
  0x2c   : > { %231 = vst [vmem:[%s207_s28] sm:$0xf] %v975_v2 }
  0x2d   : > { %233 = vst [vmem:[%s207_s28 + $0x4] sm:$0xf] %v976_v3 }
  0x2e PF: > { %p977_p12 = scmp.ge.s32.totalorder %s1236_s20, 1  ;;  %p260_p13 = scmp.lt.s32.totalorder %s1236_s20, 5 }
  0x30   : > { %p261_p0 = pnand %p977_p12, %p260_p13 }
  0x31   : > { %s274_s26 = sand.u32 (!%p261_p0), 1, %s1204_s12   ;;  %s267_s4 = sand.u32 (!%p261_p0), 1, %s1212_s14  }
  0x32   : > { %264 = sbr.rel (%p261_p0) target bundleno = 397 (0x18d), region = 103  ;;  %s979_s11 = sshll.u32 (!%p261_p0), %s274_s26, 3 }
  0x33   : > { %s978_s5 = sshll.u32 (!%p261_p0), %s267_s4, 4  ;;  %s276_s6 = scalar_lea.vmem (!%p261_p0), [#allocation3], %s979_s11 }
  0x34   : > { %s269_s27 = scalar_lea.vmem (!%p261_p0), [#allocation2], %s978_s5  ;;  %s1238_s7 = smov (!%p261_p0), 127  }
  0x35   : > { %s1239_s8 = smov (!%p261_p0), 126   ;;  %s1240_s12 = smov (!%p261_p0), 96  }
  0x36   : > { %s1241_s24 = smov (!%p261_p0), 95   ;;  %s1242_s25 = smov (!%p261_p0), 94  }
  0x37   : > { %v991_v4 = vld [vmem:[%s276_s6] sm:$0xf]  ;;  %v1075_v5 = vld [vmem:[%s276_s6] sm:$0x30]  ;;  %v1074_v8 = vld [vmem:[%s269_s27 + $0x4] sm:$0x30] }
  0x38   : > { %v992_v6 = vor.u32 %v1075_v5, %v991_v4  ;;  %v983_v7 = vld [vmem:[%s269_s27] sm:$0xf]  ;;  %v1073_v9 = vld [vmem:[%s269_s27 + $0x4] sm:$0xf]  ;;  %v985_v11 = vld [vmem:[%s269_s27 + $0x8] sm:$0x30] }
  0x39   : > { %v984_v10 = vor.u32 %v1074_v8, %v983_v7  ;;  %v988_v12 = vor.u32 %v1073_v9, %v985_v11  ;;  %s1243_s29 = smov 64   ;;  %s1244_s21 = smov 63   ;;  %vm345_vm0 = vcmask 1045504   ;;  %v1076_v15 = vld [vmem:[%s1487_s2] sm:$0xff]  ;;  %vm341_vm1 = vcmask 97280   ;;  %v1077_v31 = vld [vmem:[%s1487_s2 + $0x8] sm:$0xff] }
  0x3a   : > { %336 = vrot.lane.b32.xlu1 %v992_v6, %s1238_s7  ;;  %s1245_s30 = smov 62   ;;  %vm436_vm2 = vcmask 1031168   ;;  %vm338_vm3 = vcmask 1039360   ;;  %vm494_vm4 = vcmask 785408   ;;  %v1079_v38 = vld [vmem:[%s1487_s2 + $0x18] sm:$0xff]  ;;  %vm552_vm5 = vcmask 777216  }
  0x3b   : > { %332 = vrot.lane.b32.xlu0 %v984_v10, %s1238_s7  ;;  %432 = vrot.lane.b32.xlu2 %v988_v12, %s1239_s8  ;;  %v389_v13 = vsel %vm345_vm0, %v984_v10, 0  ;;  %v392_v14 = vsel %vm345_vm0, %v988_v12, 0  ;;  %v1078_v47 = vld [vmem:[%s1487_s2 + $0x10] sm:$0xff]  ;;  %vm610_vm6 = vcmask 769024   ;;  %v1081_v53 = vld [vmem:[%s1487_s2 + $0x28] sm:$0xff]  ;;  %vm668_vm7 = vcmask 523264  }
  0x3c   : > { %401 = vmatpush.bf16.msra.mxu2 %v389_v13  ;;  %415 = vmatpush.bf16.msra.mxu3 %v392_v14  ;;  %v1080_v62 = vld [vmem:[%s1487_s2 + $0x20] sm:$0xff]  ;;  %vm726_vm8 = vcmask 515072   ;;  %v1083_v5 = vld [vmem:[%s1487_s2 + $0x38] sm:$0xff]  ;;  %vm784_vm9 = vcmask 506880   ;;  %v1082_v14 = vld [vmem:[%s1487_s2 + $0x30] sm:$0xff]  ;;  %s980_s6 = sshll.u32 %s267_s4, 5 }
  0x3d   : > { %s299_s27 = scalar_lea.vmem [#allocation4], %s980_s6  ;;  %s1064_s14 = sshll.u32 (%p1359_p10), %s1220_s16, 1 }
  0x3e   : > { %s1065_s4 = sshll.u32 (%p1359_p10), %s1224_s17, 3 }
  0x3f   : > { %1005 = vmatmul.msk.bf16.vlgmr.msra.gmra.mxu2 %vm341_vm1, %v1076_v15  ;;  %1006 = vmatmul.msk.bf16.vlgmr.msra.gmra.mxu3 %vm341_vm1, %v1076_v15  ;;  %v1084_v15 = vld [vmem:[%s1487_s2 + $0x40] sm:$0xff] }
  0x42   : > { %430 = vrot.lane.b32.xlu1 %v984_v10, %s1239_s8 }
  0x43   : > { %334 = vrot.lane.b32.xlu0 %v988_v12, %s1238_s7  ;;  %434 = vrot.lane.b32.xlu2 %v992_v6, %s1239_s8  ;;  %s841_s7 = sadd.s32 (%p1359_p10), %s1065_s4, %s1064_s14 }
  0x44   : > { %s1066_s8 = sshll.u32 (%p1359_p10), %s841_s7, 3 }
  0x4a   : > { %490 = vrot.lane.b32.xlu1 %v988_v12, %s1240_s12 }
  0x4b   : > { %488 = vrot.lane.b32.xlu0 %v984_v10, %s1240_s12  ;;  %492 = vrot.lane.b32.xlu2 %v992_v6, %s1240_s12 }
  0x52   : > { %548 = vrot.lane.b32.xlu1 %v988_v12, %s1241_s24 }
  0x53   : > { %546 = vrot.lane.b32.xlu0 %v984_v10, %s1241_s24  ;;  %550 = vrot.lane.b32.xlu2 %v992_v6, %s1241_s24 }
  0x5a   : > { %606 = vrot.lane.b32.xlu1 %v988_v12, %s1242_s25 }
  0x5b   : > { %604 = vrot.lane.b32.xlu0 %v984_v10, %s1242_s25  ;;  %608 = vrot.lane.b32.xlu2 %v992_v6, %s1242_s25  ;;  %s843_s25 = scalar_lea.vmem (%p1359_p10), %s1488_s3, %s1066_s8 }
  0x62   : > { %664 = vrot.lane.b32.xlu1 %v988_v12, %s1243_s29 }
  0x63   : > { %662 = vrot.lane.b32.xlu0 %v984_v10, %s1243_s29  ;;  %666 = vrot.lane.b32.xlu2 %v992_v6, %s1243_s29 }
  0x6a   : > { %722 = vrot.lane.b32.xlu1 %v988_v12, %s1244_s21 }
  0x6b   : > { %720 = vrot.lane.b32.xlu0 %v984_v10, %s1244_s21  ;;  %724 = vrot.lane.b32.xlu2 %v992_v6, %s1244_s21 }
  0x72   : > { %780 = vrot.lane.b32.xlu1 %v988_v12, %s1245_s30 }
  0x73   : > { %778 = vrot.lane.b32.xlu0 %v984_v10, %s1245_s30  ;;  %782 = vrot.lane.b32.xlu2 %v992_v6, %s1245_s30 }
  0x95   : > { %v433_v16 = vpop.permute.xlu2 %432 }
  0x9d   : > { %v435_v17 = vpop.permute.xlu2 %434 }
  0x9e   : > { %v438_v21 = vsel %vm436_vm2, %v433_v16, %v435_v17 }
  0x9f   : > { %v446_v28 = vsel %vm345_vm0, %v438_v21, 0 }
  0xa5   : > { %v493_v20 = vpop.permute.xlu2 %492 }
  0xac   : > { %v337_v18 = vpop.permute.xlu1 %336 }
  0xad   : > { %v333_v19 = vpop.permute.xlu0 %332  ;;  %v551_v33 = vpop.permute.xlu2 %550 }
  0xb4   : > { %v431_v22 = vpop.permute.xlu1 %430 }
  0xb5   : > { %v335_v23 = vpop.permute.xlu0 %334  ;;  %v437_v24 = vsel %vm436_vm2, %v431_v22, %v433_v16  ;;  %v609_v45 = vpop.permute.xlu2 %608 }
  0xb6   : > { %v339_v25 = vsel %vm338_vm3, %v333_v19, %v335_v23  ;;  %v340_v26 = vsel %vm338_vm3, %v335_v23, %v337_v18  ;;  %v443_v27 = vsel %vm345_vm0, %v437_v24, 0 }
  0xb7   : > { %v347_v29 = vsel %vm345_vm0, %v339_v25, 0  ;;  %v350_v30 = vsel %vm345_vm0, %v340_v26, 0 }
  0xb8   : > { %359 = vmatpush.bf16.msra.mxu0 %v347_v29  ;;  %373 = vmatpush.bf16.msra.mxu1 %v350_v30 }
  0xbb   : > { %999 = vmatmul.msk.bf16.vlgmr.msra.gmra.mxu0 %vm341_vm1, %v1077_v31  ;;  %1000 = vmatmul.msk.bf16.vlgmr.msra.gmra.mxu1 %vm341_vm1, %v1077_v31 }
  0xbc   : > { %455 = vmatpush.bf16.msrb.mxu0 %v443_v27  ;;  %469 = vmatpush.bf16.msrb.mxu1 %v446_v28  ;;  %v491_v32 = vpop.permute.xlu1 %490 }
  0xbd   : > { %v489_v34 = vpop.permute.xlu0 %488  ;;  %v496_v35 = vsel %vm494_vm4, %v491_v32, %v493_v20  ;;  %v667_v55 = vpop.permute.xlu2 %666 }
  0xbe   : > { %v495_v36 = vsel %vm494_vm4, %v489_v34, %v491_v32  ;;  %v504_v37 = vsel %vm345_vm0, %v496_v35, 0 }
  0xbf   : > { %v501_v39 = vsel %vm345_vm0, %v495_v36, 0  ;;  %527 = vmatpush.bf16.msrb.mxu3 %v504_v37 }
  0xc0   : > { %513 = vmatpush.bf16.msrb.mxu2 %v501_v39 }
  0xc2   : > { %1022 = vmatmul.msk.bf16.vlgmr.msrb.gmra.mxu3 %vm341_vm1, %v1079_v38  ;;  %v403_v16 = vpop.f32.mrf.mxu2  ;;  %v417_v17 = vpop.f32.mrf.mxu3 }
  0xc3   : > { %1021 = vmatmul.msk.bf16.vlgmr.msrb.gmra.mxu2 %vm341_vm1, %v1079_v38 }
  0xc4   : > { %v549_v40 = vpop.permute.xlu1 %548 }
  0xc5   : > { %v554_v41 = vsel %vm552_vm5, %v549_v40, %v551_v33  ;;  %v547_v42 = vpop.permute.xlu0 %546  ;;  %v725_v63 = vpop.permute.xlu2 %724 }
  0xc6   : > { %v562_v43 = vsel %vm345_vm0, %v554_v41, 0  ;;  %v553_v44 = vsel %vm552_vm5, %v547_v42, %v549_v40 }
  0xc7   : > { %v559_v46 = vsel %vm345_vm0, %v553_v44, 0  ;;  %585 = vmatpush.bf16.msra.mxu1 %v562_v43 }
  0xc8   : > { %571 = vmatpush.bf16.msra.mxu0 %v559_v46 }
  0xca   : > { %v405_v22 = vpop.f32.mrf.mxu2  ;;  %v419_v23 = vpop.f32.mrf.mxu3 }
  0xcb   : > { %1013 = vmatmul.msk.bf16.vlgmr.msrb.gmra.mxu0 %vm341_vm1, %v1078_v47  ;;  %1014 = vmatmul.msk.bf16.vlgmr.msrb.gmra.mxu1 %vm341_vm1, %v1078_v47 }
  0xcc   : > { %v607_v48 = vpop.permute.xlu1 %606 }
  0xcd   : > { %v612_v49 = vsel %vm610_vm6, %v607_v48, %v609_v45  ;;  %v605_v50 = vpop.permute.xlu0 %604  ;;  %v783_v7 = vpop.permute.xlu2 %782 }
  0xce   : > { %v620_v51 = vsel %vm345_vm0, %v612_v49, 0  ;;  %v611_v52 = vsel %vm610_vm6, %v605_v50, %v607_v48 }
  0xcf   : > { %v617_v54 = vsel %vm345_vm0, %v611_v52, 0  ;;  %643 = vmatpush.bf16.msra.mxu3 %v620_v51 }
  0xd0   : > { %629 = vmatpush.bf16.msra.mxu2 %v617_v54 }
  0xd2   : > { %1038 = vmatmul.msk.bf16.vlgmr.msra.gmra.mxu3 %vm341_vm1, %v1081_v53 }
  0xd3   : > { %1037 = vmatmul.msk.bf16.vlgmr.msra.gmra.mxu2 %vm341_vm1, %v1081_v53 }
  0xd4   : > { %v665_v56 = vpop.permute.xlu1 %664 }
  0xd5   : > { %v670_v57 = vsel %vm668_vm7, %v665_v56, %v667_v55  ;;  %v663_v58 = vpop.permute.xlu0 %662 }
  0xd6   : > { %v678_v59 = vsel %vm345_vm0, %v670_v57, 0  ;;  %v669_v60 = vsel %vm668_vm7, %v663_v58, %v665_v56 }
  0xd7   : > { %v675_v61 = vsel %vm345_vm0, %v669_v60, 0  ;;  %701 = vmatpush.bf16.msrb.mxu1 %v678_v59 }
  0xd8   : > { %687 = vmatpush.bf16.msrb.mxu0 %v675_v61 }
  0xdb   : > { %1029 = vmatmul.msk.bf16.vlgmr.msra.gmra.mxu0 %vm341_vm1, %v1080_v62  ;;  %1030 = vmatmul.msk.bf16.vlgmr.msra.gmra.mxu1 %vm341_vm1, %v1080_v62 }
  0xdc   : > { %v723_v0 = vpop.permute.xlu1 %722 }
  0xdd   : > { %v728_v1 = vsel %vm726_vm8, %v723_v0, %v725_v63  ;;  %v721_v2 = vpop.permute.xlu0 %720 }
  0xde   : > { %v736_v3 = vsel %vm345_vm0, %v728_v1, 0  ;;  %v727_v4 = vsel %vm726_vm8, %v721_v2, %v723_v0 }
  0xdf   : > { %v733_v6 = vsel %vm345_vm0, %v727_v4, 0  ;;  %759 = vmatpush.bf16.msrb.mxu3 %v736_v3 }
  0xe0   : > { %745 = vmatpush.bf16.msrb.mxu2 %v733_v6 }
  0xe2   : > { %1054 = vmatmul.msk.bf16.vlgmr.msrb.gmra.mxu3 %vm341_vm1, %v1083_v5 }
  0xe3   : > { %1053 = vmatmul.msk.bf16.vlgmr.msrb.gmra.mxu2 %vm341_vm1, %v1083_v5 }
  0xe4   : > { %v781_v8 = vpop.permute.xlu1 %780 }
  0xe5   : > { %v786_v9 = vsel %vm784_vm9, %v781_v8, %v783_v7  ;;  %v779_v10 = vpop.permute.xlu0 %778 }
  0xe6   : > { %v794_v11 = vsel %vm345_vm0, %v786_v9, 0  ;;  %v785_v12 = vsel %vm784_vm9, %v779_v10, %v781_v8 }
  0xe7   : > { %v791_v13 = vsel %vm345_vm0, %v785_v12, 0  ;;  %817 = vmatpush.bf16.msra.mxu1 %v794_v11 }
  0xe8   : > { %803 = vmatpush.bf16.msra.mxu0 %v791_v13 }
  0xeb   : > { %1045 = vmatmul.msk.bf16.vlgmr.msrb.gmra.mxu0 %vm341_vm1, %v1082_v14  ;;  %1046 = vmatmul.msk.bf16.vlgmr.msrb.gmra.mxu1 %vm341_vm1, %v1082_v14 }
  0xfb   : > { %1061 = vmatmul.msk.bf16.vlgmr.msra.gmra.mxu0 %vm341_vm1, %v1084_v15  ;;  %1062 = vmatmul.msk.bf16.vlgmr.msra.gmra.mxu1 %vm341_vm1, %v1084_v15 }
 0x138   : > { %v361_v18 = vpop.f32.mrf.mxu0  ;;  %v375_v19 = vpop.f32.mrf.mxu1 }
 0x139   : > { %v404_v38 = vadd.f32 %v403_v16, %v361_v18  ;;  %v418_v39 = vadd.f32 %v417_v17, %v375_v19 }
 0x140   : > { %v363_v20 = vpop.f32.mrf.mxu0  ;;  %v377_v21 = vpop.f32.mrf.mxu1 }
 0x141   : > { %v406_v48 = vadd.f32 %v405_v22, %v363_v20  ;;  %v420_v49 = vadd.f32 %v419_v23, %v377_v21 }
 0x145   : > { %v529_v27 = vpop.f32.mrf.mxu3 }
 0x146   : > { %v515_v26 = vpop.f32.mrf.mxu2 }
 0x148   : > { %v457_v24 = vpop.f32.mrf.mxu0  ;;  %v471_v25 = vpop.f32.mrf.mxu1 }
 0x149   : > { %v476_v40 = vadd.f32 %v457_v24, %v404_v38  ;;  %v477_v41 = vadd.f32 %v471_v25, %v418_v39 }
 0x14b   : > { %v534_v46 = vadd.f32 %v515_v26, %v476_v40  ;;  %v535_v47 = vadd.f32 %v529_v27, %v477_v41 }
 0x14d   : > { %v531_v31 = vpop.f32.mrf.mxu3 }
 0x14e   : > { %v517_v30 = vpop.f32.mrf.mxu2 }
 0x150   : > { %v459_v28 = vpop.f32.mrf.mxu0  ;;  %v473_v29 = vpop.f32.mrf.mxu1 }
 0x151   : > { %v478_v52 = vadd.f32 %v459_v28, %v406_v48  ;;  %v479_v53 = vadd.f32 %v473_v29, %v420_v49 }
 0x153   : > { %v536_v60 = vadd.f32 %v517_v30, %v478_v52  ;;  %v537_v61 = vadd.f32 %v531_v31, %v479_v53 }
 0x155   : > { %v645_v35 = vpop.f32.mrf.mxu3 }
 0x156   : > { %v631_v34 = vpop.f32.mrf.mxu2 }
 0x158   : > { %v573_v32 = vpop.f32.mrf.mxu0  ;;  %v587_v33 = vpop.f32.mrf.mxu1 }
 0x159   : > { %v592_v50 = vadd.f32 %v573_v32, %v534_v46  ;;  %v593_v51 = vadd.f32 %v587_v33, %v535_v47 }
 0x15b   : > { %v650_v56 = vadd.f32 %v631_v34, %v592_v50  ;;  %v651_v57 = vadd.f32 %v645_v35, %v593_v51 }
 0x15d   : > { %v647_v43 = vpop.f32.mrf.mxu3 }
 0x15e   : > { %v633_v42 = vpop.f32.mrf.mxu2 }
 0x160   : > { %v575_v36 = vpop.f32.mrf.mxu0  ;;  %v589_v37 = vpop.f32.mrf.mxu1 }
 0x161   : > { %v594_v0 = vadd.f32 %v575_v36, %v536_v60  ;;  %v595_v1 = vadd.f32 %v589_v37, %v537_v61 }
 0x163   : > { %v652_v6 = vadd.f32 %v633_v42, %v594_v0  ;;  %v653_v7 = vadd.f32 %v647_v43, %v595_v1 }
 0x165   : > { %v761_v59 = vpop.f32.mrf.mxu3 }
 0x166   : > { %v747_v58 = vpop.f32.mrf.mxu2 }
 0x168   : > { %v689_v44 = vpop.f32.mrf.mxu0  ;;  %v703_v45 = vpop.f32.mrf.mxu1 }
 0x169   : > { %v708_v62 = vadd.f32 %v689_v44, %v650_v56  ;;  %v709_v63 = vadd.f32 %v703_v45, %v651_v57 }
 0x16b   : > { %v766_v2 = vadd.f32 %v747_v58, %v708_v62  ;;  %v767_v3 = vadd.f32 %v761_v59, %v709_v63 }
 0x16d   : > { %v763_v13 = vpop.f32.mrf.mxu3 }
 0x16e   : > { %v749_v12 = vpop.f32.mrf.mxu2 }
 0x170   : > { %v691_v54 = vpop.f32.mrf.mxu0  ;;  %v705_v55 = vpop.f32.mrf.mxu1 }
 0x171   : > { %v710_v10 = vadd.f32 %v691_v54, %v652_v6  ;;  %v711_v11 = vadd.f32 %v705_v55, %v653_v7 }
 0x173   : > { %v768_v14 = vadd.f32 %v749_v12, %v710_v10  ;;  %v769_v15 = vadd.f32 %v763_v13, %v711_v11 }
 0x178   : > { %v805_v4 = vpop.f32.mrf.mxu0  ;;  %v819_v5 = vpop.f32.mrf.mxu1 }
 0x179   : > { %v824_v8 = vadd.f32 %v805_v4, %v766_v2  ;;  %v825_v9 = vadd.f32 %v819_v5, %v767_v3 }
 0x17b   : > { %828 = vst [vmem:[%s299_s27] sm:$0xff] %v824_v8 }
 0x17c   : > { %829 = vst [vmem:[%s299_s27 + $0x8] sm:$0xff] %v825_v9 }
 0x180   : > { %v807_v16 = vpop.f32.mrf.mxu0  ;;  %v821_v17 = vpop.f32.mrf.mxu1  ;;  %838 = sbr.rel (!%p1359_p10) target bundleno = 397 (0x18d), region = 115 }
 0x181   : > { %v826_v18 = vadd.f32 %v807_v16, %v768_v14  ;;  %v827_v19 = vadd.f32 %v821_v17, %v769_v15 }
 0x182   : > { %v856_v20 = vld [vmem:[%s299_s27] sm:$0xff] (%p1359_p10) }
 0x183   : > { %830 = vst [vmem:[%s299_s27 + $0x10] sm:$0xff] %v826_v18  ;;  %v858_v21 = vld [vmem:[%s299_s27 + $0x8] sm:$0xff] (%p1359_p10) }
 0x184   : > { %831 = vst [vmem:[%s299_s27 + $0x18] sm:$0xff] %v827_v19 }
 0x185   : > { %857 = vst [vmem:[%s843_s25] sm:$0xff] %v856_v20 }
 0x186   : > { %859 = vst [vmem:[%s843_s25 + $0x8] sm:$0xff] %v858_v21 }
 0x18a   : > { %v860_v22 = vld [vmem:[%s299_s27 + $0x10] sm:$0xff] }
 0x18b   : > { %v862_v23 = vld [vmem:[%s299_s27 + $0x18] sm:$0xff]  ;;  %861 = vst [vmem:[%s843_s25 + $0x20] sm:$0xff] %v860_v22 }
 0x18c   : > { %863 = vst [vmem:[%s843_s25 + $0x28] sm:$0xff] %v862_v23 }
 0x18d PF: > { %s13_s20 = sadd.s32 1, %s1236_s20   ;;  %s1494_s23 = sld [smem:[#allocation5_spill]] }
 0x18e   : > { %p10_p1 = scmp.ge.s32.totalorder %s13_s20, 6   ;;  %s1495_s12 = smov %s1208_s13 }
 0x18f   : > { %s1496_s13 = smov %s1348_s10  ;;  %s1497_s14 = smov %s1216_s15 }
 0x190   : > { %s1498_s15 = smov %s1345_s9  ;;  %s1499_s16 = smov %s1228_s18 }
 0x191   : > { %s1500_s17 = smov %s1232_s19  ;;  %s1501_s18 = smov %s1504_s22 }
 0x192   :  { %12 = sbr.rel (!%p10_p1) target bundleno = 5 (0x5), region = 185 }
 0x193   : > { %s1502_s19 = smov %s1494_s23 }

</bundles_post_ra>
